<compile_context>
chip_gen: v5e
topology: v5e:2x2
jax: 0.10.0
libtpu: 0.0.40
codegen_flags: <defaults>
</compile_context>

<pallas_src>
import functools
import numpy as np
import jax
import jax.numpy as jnp
from jax.experimental import pallas as pl
from jax.experimental.pallas import tpu as pltpu

_LANE = 128


def _round_up(n, m):
    return ((n + m - 1) // m) * m


# ----------------------------- Pallas kernel ------------------------------ #
def _fused_linear_kernel(x_ref, w_ref, b_ref, o_ref):
    # x_ref: (tm, H)   w_ref: (H, A_pad)   b_ref: (1, A_pad)   o_ref: (tm, A_pad)
    o_ref[...] = (
        jnp.dot(x_ref[...], w_ref[...], preferred_element_type=jnp.float32)
        + b_ref[...]
    )


def _pallas_fused_linear(x2d, w_t, b_row, *, tm=512):
    """x2d: (M, H) f32, w_t: (H, A_pad) f32, b_row: (1, A_pad) f32 -> (M, A_pad)."""
    M, H = x2d.shape
    A = w_t.shape[1]  # already a multiple of 128 (lane-dense output)

    if M <= tm:
        # Small problem: single full-array block, no grid, no pipelining knobs.
        return pl.pallas_call(
            _fused_linear_kernel,
            out_shape=jax.ShapeDtypeStruct((M, A), jnp.float32),
            in_specs=[
                pl.BlockSpec((M, H), lambda: (0, 0)),
                pl.BlockSpec((H, A), lambda: (0, 0)),
                pl.BlockSpec((1, A), lambda: (0, 0)),
            ],
            out_specs=pl.BlockSpec((M, A), lambda: (0, 0)),
        )(x2d, w_t, b_row)

    # Large M: tile rows so the x stream is double-buffered and VMEM-bounded.
    # TODO(synk): cast x/w to bf16 with f32 accumulation when hidden is large
    # (kept f32 here to preserve exact parity with the PyTorch reference).
    Mp = _round_up(M, tm)
    if Mp != M:
        x2d = jnp.pad(x2d, ((0, Mp - M), (0, 0)))
    out = pl.pallas_call(
        _fused_linear_kernel,
        out_shape=jax.ShapeDtypeStruct((Mp, A), jnp.float32),
        grid=(Mp // tm,),
        in_specs=[
            pl.BlockSpec((tm, H), lambda i: (i, 0)),
            pl.BlockSpec((H, A), lambda i: (0, 0)),   # weights stay resident
            pl.BlockSpec((1, A), lambda i: (0, 0)),
        ],
        out_specs=pl.BlockSpec((tm, A), lambda i: (i, 0)),
        compiler_params=pltpu.CompilerParams(
            dimension_semantics=("parallel",)),
    )(x2d, w_t, b_row)
    return out[:M]


# --------------------------- parameter creation ---------------------------- #
def _orthogonal(key, out_dim, in_dim, gain):
    """Deterministic orthogonal init (matches nn.init.orthogonal_ semantics)."""
    a = jax.random.normal(key, (max(out_dim, in_dim), min(out_dim, in_dim)),
                          dtype=jnp.float32)
    q, r = jnp.linalg.qr(a)
    q = q * jnp.sign(jnp.diag(r))[None, :]
    if out_dim < in_dim:
        q = q.T
    return gain * q[:out_dim, :in_dim]


def make_act_layer_params(config, act_dim, key):
    """Returns list of (weight(out,in), bias(out,)) — one per action head."""
    gain = config["gain"]
    hidden = config["hidden_size"]
    dims = list(act_dim) if isinstance(act_dim, np.ndarray) else [act_dim]
    params = []
    for i, a_dim in enumerate(dims):
        k = jax.random.fold_in(key, i)
        a_dim = int(a_dim)
        if config["use_orthogonal"]:
            w = _orthogonal(k, a_dim, hidden, gain)
        else:
            # xavier_uniform with gain
            limit = gain * np.sqrt(6.0 / (hidden + a_dim))
            w = jax.random.uniform(k, (a_dim, hidden), jnp.float32, -limit, limit)
        b = jnp.zeros((a_dim,), jnp.float32)  # constant_(x, 0)
        params.append((w, b))
    return params


def pack_act_layer_params(params):
    """Fuse per-head (out,in) weights into one lane-padded (H, A_pad) matrix.

    Done ONCE at pack time so the forward pass has no per-call transpose /
    concatenation and runs a single pallas_call for all heads.
    """
    dims = tuple(int(w.shape[0]) for w, _ in params)
    hidden = int(params[0][0].shape[1])
    a_total = sum(dims)
    a_pad = _round_up(a_total, _LANE)

    w_cat = jnp.concatenate([w.T for w, _ in params], axis=1)      # (H, A_total)
    b_cat = jnp.concatenate([b for _, b in params], axis=0)        # (A_total,)

    w_t = jnp.zeros((hidden, a_pad), jnp.float32).at[:, :a_total].set(w_cat)
    b_row = jnp.zeros((1, a_pad), jnp.float32).at[:, :a_total].set(b_cat)
    return {"w_t": w_t, "b_row": b_row, "dims": dims}


# ------------------------------ forward pass ------------------------------- #
@functools.partial(jax.jit,
                   static_argnames=("dims", "multi_discrete", "no_sequence"))
def _act_layer_forward_jit(w_t, b_row, x, *, dims, multi_discrete, no_sequence):
    if no_sequence:
        # Slice BEFORE the kernel: M = batch instead of seq*batch.
        x2d = x[0]                                  # (batch, hidden)
        lead_shape = (x.shape[1],)
    else:
        seq, batch, hidden = x.shape
        x2d = x.reshape(seq * batch, hidden)
        lead_shape = (seq, batch)

    out = _pallas_fused_linear(x2d, w_t, b_row)     # (M, A_pad)

    outs = []
    off = 0
    for d in dims:
        outs.append(out[:, off:off + d].reshape(lead_shape + (d,)))
        off += d
    return outs if multi_discrete else outs[0]


def act_layer_forward(packed, x, multi_discrete, no_sequence=False):
    """packed: dict from pack_act_layer_params; x: (seq, batch, hidden) f32."""
    return _act_layer_forward_jit(
        packed["w_t"], packed["b_row"], x,
        dims=packed["dims"], multi_discrete=bool(multi_discrete),
        no_sequence=bool(no_sequence))


# ---------------------------------- main ----------------------------------- #
if __name__ == "__main__":
    config = {"use_orthogonal": 1, "gain": 0.01, "hidden_size": 32}
    seq, batch, hidden = 8, 2, config["hidden_size"]

    key = jax.random.PRNGKey(0)
    kx, kp = jax.random.split(key)
    x = jax.random.normal(kx, (seq, batch, hidden), dtype=jnp.float32)

    # --- single-discrete head ---
    act_dim = 6
    params = make_act_layer_params(config, act_dim, kp)
    packed = pack_act_layer_params(params)

    out = act_layer_forward(packed, x, multi_discrete=False, no_sequence=False)
    out = jax.block_until_ready(out)
    assert out.shape == (seq, batch, act_dim)

    w, b = params[0]
    ref = x @ w.T + b
    np.testing.assert_allclose(np.asarray(out), np.asarray(ref),
                               rtol=1e-5, atol=1e-5)

    # no_sequence=True path (first time step only; sliced before the kernel)
    out_ns = jax.block_until_ready(
        act_layer_forward(packed, x, multi_discrete=False, no_sequence=True))
    assert out_ns.shape == (batch, act_dim)
    np.testing.assert_allclose(np.asarray(out_ns), np.asarray(ref[0]),
                               rtol=1e-5, atol=1e-5)

    # --- multi-discrete heads (all heads fused into one pallas_call) ---
    md_dims = np.array([3, 5])
    md_params = make_act_layer_params(config, md_dims, kp)
    md_packed = pack_act_layer_params(md_params)

    md_outs = act_layer_forward(md_packed, x, multi_discrete=True,
                                no_sequence=False)
    md_outs = jax.block_until_ready(md_outs)
    for (w_i, b_i), o_i, d in zip(md_params, md_outs, md_dims):
        assert o_i.shape == (seq, batch, int(d))
        np.testing.assert_allclose(np.asarray(o_i),
                                   np.asarray(x @ w_i.T + b_i),
                                   rtol=1e-5, atol=1e-5)

    md_outs_ns = jax.block_until_ready(
        act_layer_forward(md_packed, x, multi_discrete=True, no_sequence=True))
    for (w_i, b_i), o_i, d in zip(md_params, md_outs_ns, md_dims):
        assert o_i.shape == (batch, int(d))
        np.testing.assert_allclose(np.asarray(o_i),
                                   np.asarray(x[0] @ w_i.T + b_i),
                                   rtol=1e-5, atol=1e-5)

    print("KERNEL_OK")
</pallas_src>

<mosaic_0001>
module attributes {stable_mosaic.version = 11 : i64} {
  func.func @_fused_linear_kernel(%arg0: memref<16x32xf32, #tpu.memory_space<vmem>>, %arg1: memref<32x128xf32, #tpu.memory_space<vmem>>, %arg2: memref<1x128xf32, #tpu.memory_space<vmem>>, %arg3: memref<16x128xf32, #tpu.memory_space<vmem>>) attributes {dimension_semantics = [], scalar_prefetch = 0 : i64, scratch_operands = 0 : i64, tpu.core_type = #tpu.core_type<tc>} {
    %c0 = arith.constant 0 : index
    %c0_0 = arith.constant 0 : index
    %0 = vector.load %arg0[%c0, %c0_0] : memref<16x32xf32, #tpu.memory_space<vmem>>, vector<16x32xf32>
    %c0_1 = arith.constant 0 : index
    %c0_2 = arith.constant 0 : index
    %1 = vector.load %arg1[%c0_1, %c0_2] : memref<32x128xf32, #tpu.memory_space<vmem>>, vector<32x128xf32>
    %cst = arith.constant dense<0.000000e+00> : vector<16x128xf32>
    %2 = tpu.matmul %0, %1, %cst {dimension_numbers = #tpu.dot_dimension_numbers<[1], [0], [0], [1], [0, 0, 1, 1], [], []>} : vector<16x32xf32>, vector<32x128xf32>, vector<16x128xf32> -> vector<16x128xf32>
    %c0_3 = arith.constant 0 : index
    %c0_4 = arith.constant 0 : index
    %3 = vector.load %arg2[%c0_3, %c0_4] : memref<1x128xf32, #tpu.memory_space<vmem>>, vector<1x128xf32>
    %4 = vector.broadcast %3 : vector<1x128xf32> to vector<16x128xf32>
    %5 = arith.addf %2, %4 : vector<16x128xf32>
    %c0_5 = arith.constant 0 : index
    %c0_6 = arith.constant 0 : index
    %6 = vector.load %arg3[%c0_5, %c0_6] : memref<16x128xf32, #tpu.memory_space<vmem>>, vector<16x128xf32>
    tpu.vector_store %arg3[%c0_5, %c0_6], %5 {strides = array<i32>} : memref<16x128xf32, #tpu.memory_space<vmem>>, vector<16x128xf32>,
    return
  }
}

</mosaic_0001>

<bundles_post_ra>
// kernel: _act_layer_forward_jit.1
= control target key start
LH: loop header
LB: loop body
LE: loop exit
PB: predicated region body
PF: predicated region fallthrough
CT: control target
= control target key end

     0   :  { %8 = vsyncpa [#allocation3], 0  ;;  %s196_s0 = inlined_call_operand.hbm [shape: f32[16,32], index: 0, kind: input, shape index: {}]   ;;  %s197_s1 = inlined_call_operand.hbm [shape: f32[32,128], index: 1, kind: input, shape index: {}]   ;;  %s198_s2 = inlined_call_operand.vmem [shape: f32[1,128], index: 2, kind: input, shape index: {}]   ;;  %s199_s3 = inlined_call_operand.vmem [shape: f32[16,128], index: 3, kind: output, shape index: {}]  }
   0x1   :  { %s14_s14 = sshll.u32 %s196_s0, 4  ;;  %s15_s14 = int_to_ptr.hbm [resolvable:$true] %s14_s14 }
   0x2   :  { %9 = vsyncpa [#allocation5], 0  ;;  %s157_s15 = smov [#allocation2]   ;;  %s27_s19 = sshll.u32 %s197_s1, 4  ;;  %s28_s19 = int_to_ptr.hbm [resolvable:$true] %s27_s19 }
   0x3   :  { %s16_s16 = sshll.u32 %s157_s15, 4  ;;  %s158_s20 = smov 128   ;;  %s17_s16 = int_to_ptr.vmem [resolvable:$true] %s16_s16 }
   0x4   :  { %s159_s21 = smov 8   ;;  %s160_s22 = smov [#allocation4]  }
   0x5   :  { %22 = dma.hbm_to_vmem [thread:$0]  %s15_s14, 256, %s17_s16, [#allocation3], %s158_s20, %s158_s20, %s159_s21  }
   0x6   :  { %s29_s23 = sshll.u32 %s160_s22, 4  ;;  %s30_s23 = int_to_ptr.vmem [resolvable:$true] %s29_s23 }
   0x7   :  { %35 = dma.hbm_to_vmem [thread:$0]  %s28_s19, 512, %s30_s23, [#allocation5], %s158_s20, %s158_s20, %s159_s21  }
   0x8   :  { %153 = dma.done.wait [#allocation3], 256  }
   0x9   :  { %154 = vsyncadd [#allocation3], 4294967040 }
   0xa   :  { %155 = dma.done.wait [#allocation5], 512  }
   0xb   :  { %156 = vsyncadd [#allocation5], 4294966784  ;;  %v51_v0 = vld [vmem:[#allocation4 + $0x18] sm:$0xff]  ;;  %v50_v1 = vld [vmem:[#allocation4 + $0x10] sm:$0xff]  ;;  %vm56_vm0 = vcmask 261120  }
   0xc   :  { %75 = vmatpush.msra.mxu0 %v51_v0  ;;  %96 = vmatpush.msra.mxu1 %v51_v0  ;;  %v49_v2 = vld [vmem:[#allocation4 + $0x8] sm:$0xff]  ;;  %v48_v3 = vld [vmem:[#allocation4] sm:$0xff]  ;;  %v46_v4 = vld [vmem:[#allocation2] sm:$0xff] }
   0xd   :  { %v47_v5 = vld [vmem:[#allocation2 + $0x8] sm:$0xff]  ;;  %v104_v6 = vld [vmem:[%s198_s2] ss:$0 sm:$0xff] }
   0xe   :  { %76 = vmatpush.msra.mxu0 %v50_v1  ;;  %97 = vmatpush.msra.mxu1 %v50_v1 }
  0x10   :  { %77 = vmatpush.msra.mxu0 %v49_v2  ;;  %98 = vmatpush.msra.mxu1 %v49_v2 }
  0x12   :  { %78 = vmatpush.msra.mxu0 %v48_v3  ;;  %99 = vmatpush.msra.mxu1 %v48_v3 }
  0x13   :  { %94 = vmatmul.msk.f32.vlgmr.msra.gmra.mxu0 %vm56_vm0, %v46_v4  ;;  %95 = vmatmul.msk.f32.vlgmr.msra.gmra.mxu1 %vm56_vm0, %v47_v5 }
  0x90   :  { %v80_v7 = vpop.f32.mrf.mxu0  ;;  %v83_v8 = vpop.f32.mrf.mxu1 }
  0x91   :  { %v81_v9 = vadd.f32 %v104_v6, %v80_v7  ;;  %v84_v10 = vadd.f32 %v104_v6, %v83_v8 }
  0x93   :  { %86 = vst [vmem:[%s199_s3] sm:$0xff] %v81_v9 }
  0x94   :  { %87 = vst [vmem:[%s199_s3 + $0x8] sm:$0xff] %v84_v10 }
  0x95   :  { %92 = vsyncpa [#allocation3], 1 }
  0x96   :  { %93 = vsyncpa [#allocation5], 1 }

</bundles_post_ra>
